<compile_context>
chip_gen: v6e
topology: v6e:2x2x1
jax: 0.10.0
libtpu: 0.0.40
codegen_flags: <defaults>
</compile_context>

<pallas_src>
import functools

import jax
import jax.numpy as jnp
from jax.experimental import pallas as pl
from jax.experimental.pallas import tpu as pltpu


def _round_up(x, m):
    return ((x + m - 1) // m) * m


# ----------------------------------------------------------------------------
# Pallas kernels: score a query tile against an entity tile (pure MXU matmul).
# ----------------------------------------------------------------------------
def _score_kernel_stream_q(q_ref, ent_ref, out_ref):
    # q_ref   : (TQ, D)  tile of precomputed query embeddings (e1_emb * r_emb)
    # ent_ref : (TE, D)  tile of the entity embedding table
    # out_ref : (TQ, TE) scores for this (query tile, entity tile) pair
    out_ref[...] = jax.lax.dot_general(          # (TQ, D) @ (TE, D)^T on MXU
        q_ref[...],
        ent_ref[...],
        dimension_numbers=(((1,), (1,)), ((), ())),
        preferred_element_type=jnp.float32,
    )


def _score_kernel_resident_q(q_ref, ent_ref, out_ref):
    # q_ref   : (M, D)   ALL queries, VMEM-resident (constant block index)
    # ent_ref : (TE, D)  tile of the entity embedding table
    # out_ref : (TQ, TE) scores for this (query tile, entity tile) pair
    tq = out_ref.shape[0]
    row = pl.multiple_of(pl.program_id(1) * tq, tq)
    out_ref[...] = jax.lax.dot_general(
        q_ref[pl.ds(row, tq), :],
        ent_ref[...],
        dimension_numbers=(((1,), (1,)), ((), ())),
        preferred_element_type=jnp.float32,
    )


@functools.partial(jax.jit, static_argnames=("query_tile", "entity_tile"))
def predict_scores(q, entity_table, *, query_tile=256, entity_tile=2048):
    """scores[m, e] = sum_d q[m, d] * entity_table[e, d]

    q            : (M, D)  with M a multiple of query_tile
    entity_table : (E, D)  with E a multiple of entity_tile
    """
    M, D = q.shape
    E, D2 = entity_table.shape
    assert D == D2
    assert M % query_tile == 0 and E % entity_tile == 0

    # Entity axis OUTER, query axis INNER: the entity-tile block index depends
    # only on the outer index, so each table tile is fetched from HBM once and
    # reused across all query tiles (table streamed exactly once).
    grid = (E // entity_tile, M // query_tile)

    q_bytes = jnp.dtype(q.dtype).itemsize
    e_bytes = jnp.dtype(entity_table.dtype).itemsize

    # Keep the whole q matrix resident in VMEM when it is small; otherwise
    # stream (TQ, D) tiles (q then gets re-fetched once per outer entity tile).
    q_resident = (M * D * q_bytes) <= (4 << 20)

    if q_resident:
        kernel = _score_kernel_resident_q
        q_spec = pl.BlockSpec((M, D), lambda i, j: (0, 0))   # constant -> 1 DMA
        q_vmem = M * D * q_bytes
    else:
        kernel = _score_kernel_stream_q
        q_spec = pl.BlockSpec((query_tile, D), lambda i, j: (j, 0))
        q_vmem = 2 * query_tile * D * q_bytes                # double-buffered

    vmem_needed = (
        q_vmem
        + 2 * entity_tile * D * e_bytes          # double-buffered entity tile
        + 2 * query_tile * entity_tile * 4       # double-buffered f32 out tile
    )
    try:
        vmem_cap = int(pltpu.get_tpu_info().vmem_capacity_bytes)
    except Exception:  # pragma: no cover - conservative fallback (v7x per-TC)
        vmem_cap = 64 << 20
    vmem_limit = int(min(vmem_needed + (8 << 20), vmem_cap))

    return pl.pallas_call(
        kernel,
        out_shape=jax.ShapeDtypeStruct((M, E), jnp.float32),
        grid_spec=pltpu.PrefetchScalarGridSpec(
            num_scalar_prefetch=0,
            grid=grid,
            in_specs=[
                q_spec,
                # entity table: block index constant across the inner axis
                # -> each tile fetched from HBM exactly once.
                pl.BlockSpec((entity_tile, D), lambda i, j: (i, 0)),
            ],
            # lane-dense output: last dim = entity_tile (multiple of 128)
            out_specs=pl.BlockSpec((query_tile, entity_tile),
                                   lambda i, j: (j, i)),
        ),
        compiler_params=pltpu.CompilerParams(
            dimension_semantics=("parallel", "parallel"),
            vmem_limit_bytes=vmem_limit,
        ),
    )(q, entity_table)


# ----------------------------------------------------------------------------
# LFramework-equivalent framework (forward pass only).
# ----------------------------------------------------------------------------
class LFrameworkJax:
    def __init__(self, num_entities, num_relations, dim, batch_size, key,
                 query_tile=256, entity_tile=2048):
        self.batch_size = batch_size
        self.num_entities = num_entities
        self.num_relations = num_relations
        self.dim = dim
        # kg.dummy_e / kg.dummy_r used by make_full_batch
        self.dummy_e = 0
        self.dummy_r = 0

        # Don't blow small entity tables up to a huge tile.
        self.entity_tile = min(entity_tile, _round_up(num_entities, 256))
        self.query_tile = query_tile

        k1, k2 = jax.random.split(key)
        # Deterministic synthetic "checkpoint": entity / relation embeddings.
        self.entity_embeddings = (
            jax.random.normal(k1, (num_entities, dim), dtype=jnp.float32) * 0.1
        )
        self.relation_embeddings = (
            jax.random.normal(k2, (num_relations, dim), dtype=jnp.float32) * 0.1
        )

        # Pad the entity axis once to a whole number of entity tiles; keep the
        # tile count even (when > 1) so v7x's two TensorCores split the outer
        # parallel axis evenly.  D is deliberately NOT padded.
        n_ent_tiles = -(-num_entities // self.entity_tile)
        if n_ent_tiles > 1 and n_ent_tiles % 2 == 1:
            n_ent_tiles += 1
        self.num_entities_padded = n_ent_tiles * self.entity_tile
        self.entity_table_padded = jnp.pad(
            self.entity_embeddings,
            ((0, self.num_entities_padded - num_entities), (0, 0)),
        )

    # Kept for API fidelity with LFramework.make_full_batch (padding is now
    # applied once, globally, inside forward()).
    def make_full_batch(self, mini_batch, batch_size):
        dummy_example = (self.dummy_e, self.dummy_e, self.dummy_r)
        for _ in range(batch_size - len(mini_batch)):
            mini_batch.append(dummy_example)

    def predict(self, mini_batch):
        """Score one mini-batch (routes through the same fused kernel)."""
        return self._score_examples(mini_batch)

    def _score_examples(self, examples):
        n = len(examples)
        e1 = jnp.asarray([t[0] for t in examples], dtype=jnp.int32)
        r = jnp.asarray([t[2] for t in examples], dtype=jnp.int32)

        # Glue gathers (XLA), then hoisted elementwise query construction.
        e1_emb = jnp.take(self.entity_embeddings, e1, axis=0)      # (n, D)
        r_emb = jnp.take(self.relation_embeddings, r, axis=0)      # (n, D)
        q = e1_emb * r_emb                                         # (n, D)

        # Pad the query axis once to a multiple of query_tile.
        m_padded = _round_up(max(n, 1), self.query_tile)
        q_full = jnp.pad(q, ((0, m_padded - n), (0, 0)))

        scores = predict_scores(
            q_full, self.entity_table_padded,
            query_tile=self.query_tile, entity_tile=self.entity_tile,
        )
        # Trim query padding and entity-table padding.
        return scores[:n, :self.num_entities]

    def forward(self, examples):
        # One fused call over all examples (the per-mini-batch Python loop of
        # the original module only chunks work; per-row scores are identical).
        return self._score_examples(list(examples))


# ----------------------------------------------------------------------------
# Pure-JAX reference for correctness check.
# ----------------------------------------------------------------------------
def _reference_scores(fw, examples):
    e1 = jnp.asarray([t[0] for t in examples], dtype=jnp.int32)
    r = jnp.asarray([t[2] for t in examples], dtype=jnp.int32)
    q = fw.entity_embeddings[e1] * fw.relation_embeddings[r]
    return q @ fw.entity_embeddings.T


if __name__ == "__main__":
    key = jax.random.PRNGKey(0)
    k_model, k_e1, k_e2, k_r = jax.random.split(key, 4)

    num_entities = 1000   # NOT a multiple of entity_tile -> exercises padding
    num_relations = 16
    dim = 32              # NOT a multiple of 128 -> exercises unpadded-D path
    batch_size = 8
    num_examples = 300    # not a multiple of batch_size / query_tile

    # entity_tile=512 here so the padded table has 2 tiles and the padded query
    # axis has 2 tiles -> a genuine 2x2 grid is exercised.
    fw = LFrameworkJax(num_entities, num_relations, dim, batch_size, k_model,
                       query_tile=256, entity_tile=512)

    e1s = jax.random.randint(k_e1, (num_examples,), 0, num_entities)
    e2s = jax.random.randint(k_e2, (num_examples,), 0, num_entities)
    rs = jax.random.randint(k_r, (num_examples,), 0, num_relations)
    examples = [(int(e1s[i]), int(e2s[i]), int(rs[i]))
                for i in range(num_examples)]

    scores = fw.forward(examples)
    scores = jax.block_until_ready(scores)

    ref = _reference_scores(fw, examples)
    assert scores.shape == (num_examples, num_entities), scores.shape
    assert jnp.allclose(scores, ref, atol=1e-4, rtol=1e-4), "mismatch vs reference"

    print("KERNEL_OK")
</pallas_src>

<mosaic_0001>
module attributes {stable_mosaic.version = 11 : i64} {
  func.func @_score_kernel_resident_q(%arg0: i32, %arg1: i32, %arg2: memref<512x32xf32, #tpu.memory_space<vmem>>, %arg3: memref<512x32xf32, #tpu.memory_space<vmem>>, %arg4: memref<256x512xf32, #tpu.memory_space<vmem>>) attributes {dimension_semantics = [#tpu.dimension_semantics<parallel>, #tpu.dimension_semantics<parallel>], iteration_bounds = array<i64: 2, 2>, scalar_prefetch = 0 : i64, scratch_operands = 0 : i64, tpu.core_type = #tpu.core_type<tc>, window_params = [{pipeline_mode = #tpu.pipeline_mode<synchronous>, transform_indices = @transform_0, window_bounds = array<i64: 512, 32>}, {transform_indices = @transform_1, window_bounds = array<i64: 512, 32>}, {transform_indices = @transform_2, window_bounds = array<i64: 256, 512>}]} {
    %c256_i32 = arith.constant 256 : i32
    %0 = arith.muli %arg1, %c256_i32 : i32
    %1 = tpu.assume_multiple %0, 256 : i32
    %2 = arith.index_cast %1 : i32 to index
    %c0 = arith.constant 0 : index
    %3 = vector.load %arg2[%2, %c0] : memref<512x32xf32, #tpu.memory_space<vmem>>, vector<256x32xf32>
    %c0_0 = arith.constant 0 : index
    %c0_1 = arith.constant 0 : index
    %4 = vector.load %arg3[%c0_0, %c0_1] : memref<512x32xf32, #tpu.memory_space<vmem>>, vector<512x32xf32>
    %cst = arith.constant dense<0.000000e+00> : vector<256x512xf32>
    %5 = tpu.matmul %3, %4, %cst {dimension_numbers = #tpu.dot_dimension_numbers<[1], [1], [0], [0], [0, 0, 1, 0], [], []>} : vector<256x32xf32>, vector<512x32xf32>, vector<256x512xf32> -> vector<256x512xf32>
    %c0_2 = arith.constant 0 : index
    %c0_3 = arith.constant 0 : index
    %6 = vector.load %arg4[%c0_2, %c0_3] : memref<256x512xf32, #tpu.memory_space<vmem>>, vector<256x512xf32>
    tpu.vector_store %arg4[%c0_2, %c0_3], %5 {strides = array<i32>} : memref<256x512xf32, #tpu.memory_space<vmem>>, vector<256x512xf32>,
    return
  }
  func.func @transform_0(%arg0: i32, %arg1: i32) -> (i32, i32) {
    %c0_i32 = arith.constant 0 : i32
    %c0_i32_0 = arith.constant 0 : i32
    %c0_i32_1 = arith.constant 0 : i32
    return %c0_i32, %c0_i32_0 : i32, i32
  }
  func.func @transform_1(%arg0: i32, %arg1: i32) -> (i32, i32) {
    %c0_i32 = arith.constant 0 : i32
    %c0_i32_0 = arith.constant 0 : i32
    return %arg0, %c0_i32 : i32, i32
  }
  func.func @transform_2(%arg0: i32, %arg1: i32) -> (i32, i32) {
    %c0_i32 = arith.constant 0 : i32
    return %arg1, %arg0 : i32, i32
  }
}

</mosaic_0001>

<bundles_post_ra>
// kernel: predict_scores.1
= control target key start
LH: loop header
LB: loop body
LE: loop exit
PB: predicated region body
PF: predicated region fallthrough
CT: control target
= control target key end

     0   :  { %7 = vsyncpa [#allocation3], 0  ;;  %s2384_s0 = inlined_call_operand.vmem [shape: f32[512,32], index: 0, kind: input, shape index: {}]   ;;  %s2385_s1 = inlined_call_operand.vmem [shape: f32[1024,32], index: 1, kind: input, shape index: {}]   ;;  %s2386_s2 = inlined_call_operand.hbm [shape: f32[512,1024], index: 2, kind: output, shape index: {}]  }
   0x1   :  { %9 = vsyncpa [#allocation3 + $0x1], 0  ;;  %s1808_s9 = smov 0   ;;  %s1810_s10 = smov 0  }
   0x2   :  { %s1812_s11 = smov 0   ;;  %s1814_s12 = smov 0  }
   0x3   :  { %s1816_s13 = smov 0   ;;  %s1818_s14 = smov 0  }
   0x4   :  { %s1820_s15 = smov 0   ;;  %s1822_s16 = smov 0  }
   0x5 LB: > { %s1284_s17 = sadd.s32 4294967295, %s1787_s16   ;;  %s1285_s18 = sadd.s32 4294967294, %s1787_s16   ;;  %s1787_s16 = sphi %s1822_s16, %s15_s16   ;;  %s1783_s15 = sphi %s1820_s15, %s2395_s15   ;;  %s1779_s14 = sphi %s1818_s14, %s2394_s14   ;;  %s1775_s13 = sphi %s1816_s13, %s2393_s13   ;;  %s1771_s12 = sphi %s1814_s12, %s2392_s12   ;;  %s1767_s11 = sphi %s1812_s11, %s2391_s11   ;;  %s1763_s10 = sphi %s1810_s10, %s2390_s10   ;;  %s1759_s9 = sphi %s1808_s9, %s2389_s9  }
   0x6   : > { %s24_s19 = sadd.s32 1, %s1779_s14  ;;  %s27_s20 = sadd.s32 1, %s1783_s15 }
   0x7   : > { %p25_p0 = scmp.ge.s32.totalorder %s24_s19, 2  ;;  %p93_p1 = scmp.ne.s32.totalorder %s1767_s11, %s1763_s10 }
   0x8   : > { %p94_p2 = scmp.eq.s32.totalorder %s1284_s17, 3  ;;  %p99_p5 = scmp.ne.s32.totalorder %s1763_s10, %s1759_s9 }
   0x9   : > { %s2397_s19 = smov (%p25_p0, %s24_s19), 0  ;;  %s2399_s20 = smov (!%p25_p0, %s27_s20), %s1783_s15 }
   0xa   : > { %s78_s21 = ssub.s32 %s1779_s14, %s2397_s19  ;;  %p1859_p3 = por %p94_p2, %p93_p1 }
   0xb   : > { %p29_p4 = scmp.ge.s32.totalorder %s2399_s20, 2  ;;  %p100_p6 = scmp.eq.s32.totalorder %s1285_s18, 3 }
   0xc   : > { %p1288_p7 = scmp.ge.s32.totalorder %s1787_s16, 1  ;;  %p130_p9 = scmp.lt.s32.totalorder %s1787_s16, 5 }
   0xd   : > { %s2401_s20 = smov (%p29_p4, %s2399_s20), 0  ;;  %p1868_p8 = por %p100_p6, %p99_p5 }
   0xe   : > { %s79_s24 = ssub.s32 %s1783_s15, %s2401_s20  ;;  %s83_s25 = sadd.s32 1, %s1767_s11 }
   0xf   : > { %s80_s26 = sor.u32 %s79_s24, %s78_s21  ;;  %p131_p10 = pnand %p1288_p7, %p130_p9 }
  0x10   : > { %p81_p11 = scmp.eq.s32.totalorder %s80_s26, 0  ;;  %s1290_s28 = sshll.u32 (!%p131_p10), %s1775_s13, 6 }
  0x11   : > { %134 = sbr.rel (%p131_p10) target bundleno = 426 (0x1aa), region = 28  ;;  %s1292_s29 = sshll.u32 (!%p131_p10), %s1771_s12, 8 }
  0x12   : > { %s1877_s27 = scalar_select %p81_p11, %s1767_s11, %s83_s25  }
  0x13   : > { %p153_p12 = scmp.lt.s32.totalorder (!%p131_p10), %s1290_s28, 127  ;;  %s1886_s4 = scalar_lea.vmem (!%p131_p10), %s2384_s0, %s1292_s29 }
  0x14   : > { %s149_s17 = sand.u32 (!%p131_p10), 1, %s1763_s10   ;;  %s1423_s24 = sshll.u32 (!%p131_p10), %s1775_s13, 2 }
  0x15   : > { %s1289_s18 = sshll.u32 (!%p131_p10), %s149_s17, 10  ;;  %s1203_s25 = sadd.s32 (!%p131_p10), %s1423_s24, %s1292_s29 }
  0x16   : > { %vm258_vm0 = vcmask 261120   ;;  %v1889_v0 = vld [vmem:[%s1886_s4] sm:$0xff]  ;;  %s2403_s28 = smov (!%p153_p12, %s1290_s28), 127  ;;  %s2190_s21 = scalar_lea.vmem [#allocation2], %s1289_s18 }
  0x17   : > { %1461 = vmatprep.mubr.msk.f32.mxu0 %vm258_vm0, %v1889_v0  ;;  %1557 = vmatprep.mubr.msk.f32.mxu1 %vm258_vm0, %v1889_v0  ;;  %s1291_s5 = sshll.u32 %s2403_s28, 3  ;;  %s1425_s13 = sshll.u32 %s1203_s25, 7 }
  0x18   : > { %s1898_s8 = scalar_lea.vmem %s2385_s1, %s1291_s5  ;;  %s1206_s12 = sshll.u32 %s2190_s21, 4  ;;  %s2325_s12 = int_to_ptr.vmem [resolvable:$true] %s1206_s12 }
  0x19   : > { %v225_v1 = vld [vmem:[%s1898_s8 + $0xf8] sm:$0xff]  ;;  %v224_v5 = vld [vmem:[%s1898_s8 + $0xf0] sm:$0xff]  ;;  %v223_v9 = vld [vmem:[%s1898_s8 + $0xe8] sm:$0xff]  ;;  %s2321_s29 = scalar_lea.hbm %s2386_s2, %s1425_s13  ;;  %s2333_s30 = scalar_lea.sflag [#allocation3], %s149_s17 }
  0x1a   : > { %v257_v2 = vld [vmem:[%s1898_s8 + $0x1f8] sm:$0xff]  ;;  %1429 = vmatprep.subr.msk.mxu0 %vm258_vm0, %v225_v1  ;;  %v256_v6 = vld [vmem:[%s1898_s8 + $0x1f0] sm:$0xff]  ;;  %v255_v10 = vld [vmem:[%s1898_s8 + $0x1e8] sm:$0xff]  ;;  %s1695_s3 = scalar_lea.vmem %s2325_s12, 16384 }
  0x1b   : > { %v209_v3 = vld [vmem:[%s1898_s8 + $0x78] sm:$0xff]  ;;  %1525 = vmatprep.subr.msk.mxu1 %vm258_vm0, %v257_v2  ;;  %v208_v7 = vld [vmem:[%s1898_s8 + $0x70] sm:$0xff]  ;;  %v207_v11 = vld [vmem:[%s1898_s8 + $0x68] sm:$0xff]  ;;  %p1696_p13 = scmp.ne.s32.totalorder %s2325_s12, %s1695_s3 }
  0x1c   : > { %v241_v4 = vld [vmem:[%s1898_s8 + $0x178] sm:$0xff]  ;;  %1430 = vmatpush3.xpose.msk.msra.mxu0 %vm258_vm0, %v209_v3  ;;  %v240_v8 = vld [vmem:[%s1898_s8 + $0x170] sm:$0xff]  ;;  %v239_v12 = vld [vmem:[%s1898_s8 + $0x168] sm:$0xff] }
  0x1d   : > { %1526 = vmatpush3.xpose.msk.msra.mxu1 %vm258_vm0, %v241_v4  ;;  %1431 = vmatprep.subr.msk.mxu0 %vm258_vm0, %v224_v5  ;;  %v222_v13 = vld [vmem:[%s1898_s8 + $0xe0] sm:$0xff]  ;;  %v221_v17 = vld [vmem:[%s1898_s8 + $0xd8] sm:$0xff]  ;;  %v220_v21 = vld [vmem:[%s1898_s8 + $0xd0] sm:$0xff]  ;;  %p1697_p0 = pnand %p1696_p13, %p1859_p3 }
  0x1e   : > { %1527 = vmatprep.subr.msk.mxu1 %vm258_vm0, %v256_v6  ;;  %v254_v14 = vld [vmem:[%s1898_s8 + $0x1e0] sm:$0xff]  ;;  %v253_v18 = vld [vmem:[%s1898_s8 + $0x1d8] sm:$0xff]  ;;  %v252_v22 = vld [vmem:[%s1898_s8 + $0x1d0] sm:$0xff] }
  0x1f   : > { %v206_v15 = vld [vmem:[%s1898_s8 + $0x60] sm:$0xff]  ;;  %v205_v19 = vld [vmem:[%s1898_s8 + $0x58] sm:$0xff]  ;;  %v204_v23 = vld [vmem:[%s1898_s8 + $0x50] sm:$0xff]  ;;  %p1698_p1 = pneg %p1697_p0 }
  0x20   : > { %1432 = vmatpush3.xpose.msk.msra.mxu0 %vm258_vm0, %v208_v7  ;;  %v238_v16 = vld [vmem:[%s1898_s8 + $0x160] sm:$0xff]  ;;  %v237_v20 = vld [vmem:[%s1898_s8 + $0x158] sm:$0xff]  ;;  %v236_v24 = vld [vmem:[%s1898_s8 + $0x150] sm:$0xff] }
  0x21   : > { %1528 = vmatpush3.xpose.msk.msra.mxu1 %vm258_vm0, %v240_v8  ;;  %1433 = vmatprep.subr.msk.mxu0 %vm258_vm0, %v223_v9  ;;  %v219_v25 = vld [vmem:[%s1898_s8 + $0xc8] sm:$0xff]  ;;  %v218_v29 = vld [vmem:[%s1898_s8 + $0xc0] sm:$0xff]  ;;  %v217_v33 = vld [vmem:[%s1898_s8 + $0xb8] sm:$0xff] }
  0x22   : > { %1529 = vmatprep.subr.msk.mxu1 %vm258_vm0, %v255_v10  ;;  %v251_v26 = vld [vmem:[%s1898_s8 + $0x1c8] sm:$0xff]  ;;  %v250_v30 = vld [vmem:[%s1898_s8 + $0x1c0] sm:$0xff]  ;;  %v249_v34 = vld [vmem:[%s1898_s8 + $0x1b8] sm:$0xff] }
  0x23   : > { %v203_v27 = vld [vmem:[%s1898_s8 + $0x48] sm:$0xff]  ;;  %v202_v31 = vld [vmem:[%s1898_s8 + $0x40] sm:$0xff]  ;;  %v201_v35 = vld [vmem:[%s1898_s8 + $0x38] sm:$0xff] }
  0x24   : > { %1434 = vmatpush3.xpose.msk.msra.mxu0 %vm258_vm0, %v207_v11  ;;  %v235_v28 = vld [vmem:[%s1898_s8 + $0x148] sm:$0xff]  ;;  %v234_v32 = vld [vmem:[%s1898_s8 + $0x140] sm:$0xff]  ;;  %v233_v36 = vld [vmem:[%s1898_s8 + $0x138] sm:$0xff] }
  0x25   : > { %1530 = vmatpush3.xpose.msk.msra.mxu1 %vm258_vm0, %v239_v12  ;;  %1435 = vmatprep.subr.msk.mxu0 %vm258_vm0, %v222_v13  ;;  %v216_v37 = vld [vmem:[%s1898_s8 + $0xb0] sm:$0xff]  ;;  %v215_v41 = vld [vmem:[%s1898_s8 + $0xa8] sm:$0xff]  ;;  %v214_v45 = vld [vmem:[%s1898_s8 + $0xa0] sm:$0xff] }
  0x26   : > { %1531 = vmatprep.subr.msk.mxu1 %vm258_vm0, %v254_v14  ;;  %v248_v38 = vld [vmem:[%s1898_s8 + $0x1b0] sm:$0xff]  ;;  %v247_v42 = vld [vmem:[%s1898_s8 + $0x1a8] sm:$0xff]  ;;  %v246_v46 = vld [vmem:[%s1898_s8 + $0x1a0] sm:$0xff] }
  0x27   : > { %v200_v39 = vld [vmem:[%s1898_s8 + $0x30] sm:$0xff]  ;;  %v199_v43 = vld [vmem:[%s1898_s8 + $0x28] sm:$0xff]  ;;  %v198_v47 = vld [vmem:[%s1898_s8 + $0x20] sm:$0xff] }
  0x28   : > { %1436 = vmatpush3.xpose.msk.msra.mxu0 %vm258_vm0, %v206_v15  ;;  %v232_v40 = vld [vmem:[%s1898_s8 + $0x130] sm:$0xff]  ;;  %v231_v44 = vld [vmem:[%s1898_s8 + $0x128] sm:$0xff]  ;;  %v230_v48 = vld [vmem:[%s1898_s8 + $0x120] sm:$0xff] }
  0x29   : > { %1532 = vmatpush3.xpose.msk.msra.mxu1 %vm258_vm0, %v238_v16  ;;  %1437 = vmatprep.subr.msk.mxu0 %vm258_vm0, %v221_v17  ;;  %v213_v49 = vld [vmem:[%s1898_s8 + $0x98] sm:$0xff]  ;;  %v212_v53 = vld [vmem:[%s1898_s8 + $0x90] sm:$0xff]  ;;  %v211_v57 = vld [vmem:[%s1898_s8 + $0x88] sm:$0xff] }
  0x2a   : > { %1533 = vmatprep.subr.msk.mxu1 %vm258_vm0, %v253_v18  ;;  %v245_v50 = vld [vmem:[%s1898_s8 + $0x198] sm:$0xff]  ;;  %v244_v54 = vld [vmem:[%s1898_s8 + $0x190] sm:$0xff]  ;;  %v243_v58 = vld [vmem:[%s1898_s8 + $0x188] sm:$0xff] }
  0x2b   : > { %v197_v51 = vld [vmem:[%s1898_s8 + $0x18] sm:$0xff]  ;;  %v196_v55 = vld [vmem:[%s1898_s8 + $0x10] sm:$0xff]  ;;  %v195_v59 = vld [vmem:[%s1898_s8 + $0x8] sm:$0xff] }
  0x2c   : > { %1438 = vmatpush3.xpose.msk.msra.mxu0 %vm258_vm0, %v205_v19  ;;  %v229_v52 = vld [vmem:[%s1898_s8 + $0x118] sm:$0xff]  ;;  %v228_v56 = vld [vmem:[%s1898_s8 + $0x110] sm:$0xff]  ;;  %v227_v60 = vld [vmem:[%s1898_s8 + $0x108] sm:$0xff] }
  0x2d   : > { %1534 = vmatpush3.xpose.msk.msra.mxu1 %vm258_vm0, %v237_v20  ;;  %1439 = vmatprep.subr.msk.mxu0 %vm258_vm0, %v220_v21  ;;  %v210_v61 = vld [vmem:[%s1898_s8 + $0x80] sm:$0xff]  ;;  %v163_v2 = vld [vmem:[%s1886_s4 + $0x8] sm:$0xff]  ;;  %v164_v3 = vld [vmem:[%s1886_s4 + $0x10] sm:$0xff] }
  0x2e   : > { %1535 = vmatprep.subr.msk.mxu1 %vm258_vm0, %v252_v22  ;;  %v242_v62 = vld [vmem:[%s1898_s8 + $0x180] sm:$0xff]  ;;  %v165_v4 = vld [vmem:[%s1886_s4 + $0x18] sm:$0xff]  ;;  %v167_v5 = vld [vmem:[%s1886_s4 + $0x28] sm:$0xff] }
  0x2f   : > { %v194_v63 = vld [vmem:[%s1898_s8] sm:$0xff]  ;;  %v168_v6 = vld [vmem:[%s1886_s4 + $0x30] sm:$0xff]  ;;  %v169_v7 = vld [vmem:[%s1886_s4 + $0x38] sm:$0xff] }
  0x30   : > { %1440 = vmatpush3.xpose.msk.msra.mxu0 %vm258_vm0, %v204_v23  ;;  %v226_v1 = vld [vmem:[%s1898_s8 + $0x100] sm:$0xff]  ;;  %v171_v9 = vld [vmem:[%s1886_s4 + $0x48] sm:$0xff]  ;;  %v172_v10 = vld [vmem:[%s1886_s4 + $0x50] sm:$0xff] }
  0x31   : > { %1536 = vmatpush3.xpose.msk.msra.mxu1 %vm258_vm0, %v236_v24  ;;  %1441 = vmatprep.subr.msk.mxu0 %vm258_vm0, %v219_v25  ;;  %v170_v8 = vld [vmem:[%s1886_s4 + $0x40] sm:$0xff]  ;;  %v173_v11 = vld [vmem:[%s1886_s4 + $0x58] sm:$0xff]  ;;  %v175_v13 = vld [vmem:[%s1886_s4 + $0x68] sm:$0xff] }
  0x32   : > { %1537 = vmatprep.subr.msk.mxu1 %vm258_vm0, %v251_v26  ;;  %v174_v12 = vld [vmem:[%s1886_s4 + $0x60] sm:$0xff]  ;;  %v176_v14 = vld [vmem:[%s1886_s4 + $0x70] sm:$0xff]  ;;  %v177_v15 = vld [vmem:[%s1886_s4 + $0x78] sm:$0xff] }
  0x33   : > { %v178_v16 = vld [vmem:[%s1886_s4 + $0x80] sm:$0xff]  ;;  %v179_v17 = vld [vmem:[%s1886_s4 + $0x88] sm:$0xff]  ;;  %v180_v18 = vld [vmem:[%s1886_s4 + $0x90] sm:$0xff] }
  0x34   : > { %1442 = vmatpush3.xpose.msk.msra.mxu0 %vm258_vm0, %v203_v27  ;;  %v181_v19 = vld [vmem:[%s1886_s4 + $0x98] sm:$0xff]  ;;  %v182_v20 = vld [vmem:[%s1886_s4 + $0xa0] sm:$0xff]  ;;  %v183_v21 = vld [vmem:[%s1886_s4 + $0xa8] sm:$0xff] }
  0x35   : > { %1538 = vmatpush3.xpose.msk.msra.mxu1 %vm258_vm0, %v235_v28  ;;  %1443 = vmatprep.subr.msk.mxu0 %vm258_vm0, %v218_v29  ;;  %v184_v22 = vld [vmem:[%s1886_s4 + $0xb0] sm:$0xff]  ;;  %v185_v23 = vld [vmem:[%s1886_s4 + $0xb8] sm:$0xff]  ;;  %v186_v24 = vld [vmem:[%s1886_s4 + $0xc0] sm:$0xff] }
  0x36   : > { %1539 = vmatprep.subr.msk.mxu1 %vm258_vm0, %v250_v30  ;;  %v187_v25 = vld [vmem:[%s1886_s4 + $0xc8] sm:$0xff]  ;;  %v188_v26 = vld [vmem:[%s1886_s4 + $0xd0] sm:$0xff]  ;;  %v189_v27 = vld [vmem:[%s1886_s4 + $0xd8] sm:$0xff] }
  0x37   : > { %v190_v28 = vld [vmem:[%s1886_s4 + $0xe0] sm:$0xff]  ;;  %v191_v29 = vld [vmem:[%s1886_s4 + $0xe8] sm:$0xff]  ;;  %v192_v30 = vld [vmem:[%s1886_s4 + $0xf0] sm:$0xff] }
  0x38   : > { %1444 = vmatpush3.xpose.msk.msra.mxu0 %vm258_vm0, %v202_v31  ;;  %v193_v31 = vld [vmem:[%s1886_s4 + $0xf8] sm:$0xff] }
  0x39   : > { %1540 = vmatpush3.xpose.msk.msra.mxu1 %vm258_vm0, %v234_v32  ;;  %1445 = vmatprep.subr.msk.mxu0 %vm258_vm0, %v217_v33 }
  0x3a   : > { %1541 = vmatprep.subr.msk.mxu1 %vm258_vm0, %v249_v34 }
  0x3c   : > { %1446 = vmatpush3.xpose.msk.msra.mxu0 %vm258_vm0, %v201_v35 }
  0x3d   : > { %1542 = vmatpush3.xpose.msk.msra.mxu1 %vm258_vm0, %v233_v36  ;;  %1447 = vmatprep.subr.msk.mxu0 %vm258_vm0, %v216_v37 }
  0x3e   : > { %1543 = vmatprep.subr.msk.mxu1 %vm258_vm0, %v248_v38 }
  0x40   : > { %1448 = vmatpush3.xpose.msk.msra.mxu0 %vm258_vm0, %v200_v39 }
  0x41   : > { %1544 = vmatpush3.xpose.msk.msra.mxu1 %vm258_vm0, %v232_v40  ;;  %1449 = vmatprep.subr.msk.mxu0 %vm258_vm0, %v215_v41 }
  0x42   : > { %1545 = vmatprep.subr.msk.mxu1 %vm258_vm0, %v247_v42 }
  0x44   : > { %1450 = vmatpush3.xpose.msk.msra.mxu0 %vm258_vm0, %v199_v43 }
  0x45   : > { %1546 = vmatpush3.xpose.msk.msra.mxu1 %vm258_vm0, %v231_v44  ;;  %1451 = vmatprep.subr.msk.mxu0 %vm258_vm0, %v214_v45 }
  0x46   : > { %1547 = vmatprep.subr.msk.mxu1 %vm258_vm0, %v246_v46 }
  0x48   : > { %1452 = vmatpush3.xpose.msk.msra.mxu0 %vm258_vm0, %v198_v47 }
  0x49   : > { %1548 = vmatpush3.xpose.msk.msra.mxu1 %vm258_vm0, %v230_v48  ;;  %1453 = vmatprep.subr.msk.mxu0 %vm258_vm0, %v213_v49 }
  0x4a   : > { %1549 = vmatprep.subr.msk.mxu1 %vm258_vm0, %v245_v50 }
  0x4c   : > { %1454 = vmatpush3.xpose.msk.msra.mxu0 %vm258_vm0, %v197_v51 }
  0x4d   : > { %1550 = vmatpush3.xpose.msk.msra.mxu1 %vm258_vm0, %v229_v52  ;;  %1455 = vmatprep.subr.msk.mxu0 %vm258_vm0, %v212_v53 }
  0x4e   : > { %1551 = vmatprep.subr.msk.mxu1 %vm258_vm0, %v244_v54 }
  0x50   : > { %1456 = vmatpush3.xpose.msk.msra.mxu0 %vm258_vm0, %v196_v55 }
  0x51   : > { %1552 = vmatpush3.xpose.msk.msra.mxu1 %vm258_vm0, %v228_v56  ;;  %1457 = vmatprep.subr.msk.mxu0 %vm258_vm0, %v211_v57 }
  0x52   : > { %1553 = vmatprep.subr.msk.mxu1 %vm258_vm0, %v243_v58 }
  0x54   : > { %1458 = vmatpush3.xpose.msk.msra.mxu0 %vm258_vm0, %v195_v59 }
  0x55   : > { %1554 = vmatpush3.xpose.msk.msra.mxu1 %vm258_vm0, %v227_v60  ;;  %1459 = vmatprep.subr.msk.mxu0 %vm258_vm0, %v210_v61 }
  0x56   : > { %1555 = vmatprep.subr.msk.mxu1 %vm258_vm0, %v242_v62 }
  0x58   : > { %1460 = vmatpush3.xpose.msk.msra.mxu0 %vm258_vm0, %v194_v63 }
  0x59   : > { %1556 = vmatpush3.xpose.msk.msra.mxu1 %vm258_vm0, %v226_v1 }
  0x5b   : > { %1462 = vmatmul.mubr.msk.f32.vlgmr.msra.gmra.mxu0 %vm258_vm0, %v1889_v0 }
  0x5c   : > { %1558 = vmatmul.mubr.msk.f32.vlgmr.msra.gmra.mxu1 %vm258_vm0, %v1889_v0  ;;  %1463 = vmatprep.mubr.msk.f32.mxu0 %vm258_vm0, %v163_v2  ;;  %v166_v0 = vld [vmem:[%s1886_s4 + $0x20] sm:$0xff]  ;;  %s1789_s4 = smov [#allocation2]  }
  0x5d   : > { %1559 = vmatprep.mubr.msk.f32.mxu1 %vm258_vm0, %v163_v2  ;;  %s1699_s5 = sshll.u32 %s1789_s4, 4  ;;  %s1700_s5 = int_to_ptr.vmem [resolvable:$false] %s1699_s5 }
  0x5e   : > { %s1701_s6 = scalar_lea.vmem %s1700_s5, 32768  ;;  %p1702_p2 = scmp.lt.s32.totalorder %s2325_s12, %s1700_s5 }
  0x5f   : > { %1464 = vmatmul.mubr.msk.f32.gmra.mxu0 %vm258_vm0, %v163_v2  ;;  %p1703_p4 = scmp.lt.s32.totalorder %s1701_s6, %s1695_s3 }
  0x60   : > { %1560 = vmatmul.mubr.msk.f32.gmra.mxu1 %vm258_vm0, %v163_v2  ;;  %1465 = vmatprep.mubr.msk.f32.mxu0 %vm258_vm0, %v164_v3 }
  0x61   : > { %1561 = vmatprep.mubr.msk.f32.mxu1 %vm258_vm0, %v164_v3  ;;  %p1704_p5 = por %p1703_p4, %p1702_p2 }
  0x63   : > { %1466 = vmatmul.mubr.msk.f32.gmra.mxu0 %vm258_vm0, %v164_v3  ;;  %p1705_p6 = pnand %p1704_p5, %p1698_p1 }
  0x64   : > { %1562 = vmatmul.mubr.msk.f32.gmra.mxu1 %vm258_vm0, %v164_v3  ;;  %1467 = vmatprep.mubr.msk.f32.mxu0 %vm258_vm0, %v165_v4 }
  0x65   : > { %1563 = vmatprep.mubr.msk.f32.mxu1 %vm258_vm0, %v165_v4 }
  0x67   : > { %1468 = vmatmul.mubr.msk.f32.gmra.mxu0 %vm258_vm0, %v165_v4 }
  0x68   : > { %1564 = vmatmul.mubr.msk.f32.gmra.mxu1 %vm258_vm0, %v165_v4  ;;  %1469 = vmatprep.mubr.msk.f32.mxu0 %vm258_vm0, %v166_v0 }
  0x69   : > { %1565 = vmatprep.mubr.msk.f32.mxu1 %vm258_vm0, %v166_v0 }
  0x6b   : > { %1470 = vmatmul.mubr.msk.f32.gmra.mxu0 %vm258_vm0, %v166_v0 }
  0x6c   : > { %1566 = vmatmul.mubr.msk.f32.gmra.mxu1 %vm258_vm0, %v166_v0  ;;  %1471 = vmatprep.mubr.msk.f32.mxu0 %vm258_vm0, %v167_v5 }
  0x6d   : > { %1567 = vmatprep.mubr.msk.f32.mxu1 %vm258_vm0, %v167_v5 }
  0x6f   : > { %1472 = vmatmul.mubr.msk.f32.gmra.mxu0 %vm258_vm0, %v167_v5 }
  0x70   : > { %1568 = vmatmul.mubr.msk.f32.gmra.mxu1 %vm258_vm0, %v167_v5  ;;  %1473 = vmatprep.mubr.msk.f32.mxu0 %vm258_vm0, %v168_v6 }
  0x71   : > { %1569 = vmatprep.mubr.msk.f32.mxu1 %vm258_vm0, %v168_v6 }
  0x73   : > { %1474 = vmatmul.mubr.msk.f32.gmra.mxu0 %vm258_vm0, %v168_v6 }
  0x74   : > { %1570 = vmatmul.mubr.msk.f32.gmra.mxu1 %vm258_vm0, %v168_v6  ;;  %1475 = vmatprep.mubr.msk.f32.mxu0 %vm258_vm0, %v169_v7 }
  0x75   : > { %1571 = vmatprep.mubr.msk.f32.mxu1 %vm258_vm0, %v169_v7 }
  0x77   : > { %1476 = vmatmul.mubr.msk.f32.gmra.mxu0 %vm258_vm0, %v169_v7 }
  0x78   : > { %1572 = vmatmul.mubr.msk.f32.gmra.mxu1 %vm258_vm0, %v169_v7  ;;  %1477 = vmatprep.mubr.msk.f32.mxu0 %vm258_vm0, %v170_v8 }
  0x79   : > { %1573 = vmatprep.mubr.msk.f32.mxu1 %vm258_vm0, %v170_v8 }
  0x7b   : > { %1478 = vmatmul.mubr.msk.f32.gmra.mxu0 %vm258_vm0, %v170_v8 }
  0x7c   : > { %1574 = vmatmul.mubr.msk.f32.gmra.mxu1 %vm258_vm0, %v170_v8  ;;  %1479 = vmatprep.mubr.msk.f32.mxu0 %vm258_vm0, %v171_v9 }
  0x7d   : > { %1575 = vmatprep.mubr.msk.f32.mxu1 %vm258_vm0, %v171_v9 }
  0x7f   : > { %1480 = vmatmul.mubr.msk.f32.gmra.mxu0 %vm258_vm0, %v171_v9 }
  0x80   : > { %1576 = vmatmul.mubr.msk.f32.gmra.mxu1 %vm258_vm0, %v171_v9  ;;  %1481 = vmatprep.mubr.msk.f32.mxu0 %vm258_vm0, %v172_v10 }
  0x81   : > { %1577 = vmatprep.mubr.msk.f32.mxu1 %vm258_vm0, %v172_v10 }
  0x83   : > { %1482 = vmatmul.mubr.msk.f32.gmra.mxu0 %vm258_vm0, %v172_v10 }
  0x84   : > { %1578 = vmatmul.mubr.msk.f32.gmra.mxu1 %vm258_vm0, %v172_v10  ;;  %1483 = vmatprep.mubr.msk.f32.mxu0 %vm258_vm0, %v173_v11 }
  0x85   : > { %1579 = vmatprep.mubr.msk.f32.mxu1 %vm258_vm0, %v173_v11 }
  0x87   : > { %1484 = vmatmul.mubr.msk.f32.gmra.mxu0 %vm258_vm0, %v173_v11 }
  0x88   : > { %1580 = vmatmul.mubr.msk.f32.gmra.mxu1 %vm258_vm0, %v173_v11  ;;  %1485 = vmatprep.mubr.msk.f32.mxu0 %vm258_vm0, %v174_v12 }
  0x89   : > { %1581 = vmatprep.mubr.msk.f32.mxu1 %vm258_vm0, %v174_v12 }
  0x8b   : > { %1486 = vmatmul.mubr.msk.f32.gmra.mxu0 %vm258_vm0, %v174_v12 }
  0x8c   : > { %1582 = vmatmul.mubr.msk.f32.gmra.mxu1 %vm258_vm0, %v174_v12  ;;  %1487 = vmatprep.mubr.msk.f32.mxu0 %vm258_vm0, %v175_v13 }
  0x8d   : > { %1583 = vmatprep.mubr.msk.f32.mxu1 %vm258_vm0, %v175_v13 }
  0x8f   : > { %1488 = vmatmul.mubr.msk.f32.gmra.mxu0 %vm258_vm0, %v175_v13 }
  0x90   : > { %1584 = vmatmul.mubr.msk.f32.gmra.mxu1 %vm258_vm0, %v175_v13  ;;  %1489 = vmatprep.mubr.msk.f32.mxu0 %vm258_vm0, %v176_v14 }
  0x91   : > { %1585 = vmatprep.mubr.msk.f32.mxu1 %vm258_vm0, %v176_v14 }
  0x93   : > { %1490 = vmatmul.mubr.msk.f32.gmra.mxu0 %vm258_vm0, %v176_v14 }
  0x94   : > { %1586 = vmatmul.mubr.msk.f32.gmra.mxu1 %vm258_vm0, %v176_v14  ;;  %1491 = vmatprep.mubr.msk.f32.mxu0 %vm258_vm0, %v177_v15 }
  0x95   : > { %1587 = vmatprep.mubr.msk.f32.mxu1 %vm258_vm0, %v177_v15 }
  0x97   : > { %1492 = vmatmul.mubr.msk.f32.gmra.mxu0 %vm258_vm0, %v177_v15 }
  0x98   : > { %1588 = vmatmul.mubr.msk.f32.gmra.mxu1 %vm258_vm0, %v177_v15  ;;  %1493 = vmatprep.mubr.msk.f32.mxu0 %vm258_vm0, %v178_v16 }
  0x99   : > { %1589 = vmatprep.mubr.msk.f32.mxu1 %vm258_vm0, %v178_v16 }
  0x9b   : > { %1494 = vmatmul.mubr.msk.f32.gmra.mxu0 %vm258_vm0, %v178_v16 }
  0x9c   : > { %1590 = vmatmul.mubr.msk.f32.gmra.mxu1 %vm258_vm0, %v178_v16  ;;  %1495 = vmatprep.mubr.msk.f32.mxu0 %vm258_vm0, %v179_v17 }
  0x9d   : > { %1591 = vmatprep.mubr.msk.f32.mxu1 %vm258_vm0, %v179_v17 }
  0x9f   : > { %1496 = vmatmul.mubr.msk.f32.gmra.mxu0 %vm258_vm0, %v179_v17 }
  0xa0   : > { %1592 = vmatmul.mubr.msk.f32.gmra.mxu1 %vm258_vm0, %v179_v17  ;;  %1497 = vmatprep.mubr.msk.f32.mxu0 %vm258_vm0, %v180_v18 }
  0xa1   : > { %1593 = vmatprep.mubr.msk.f32.mxu1 %vm258_vm0, %v180_v18 }
  0xa3   : > { %1498 = vmatmul.mubr.msk.f32.gmra.mxu0 %vm258_vm0, %v180_v18 }
  0xa4   : > { %1594 = vmatmul.mubr.msk.f32.gmra.mxu1 %vm258_vm0, %v180_v18  ;;  %1499 = vmatprep.mubr.msk.f32.mxu0 %vm258_vm0, %v181_v19 }
  0xa5   : > { %1595 = vmatprep.mubr.msk.f32.mxu1 %vm258_vm0, %v181_v19 }
  0xa7   : > { %1500 = vmatmul.mubr.msk.f32.gmra.mxu0 %vm258_vm0, %v181_v19 }
  0xa8   : > { %1596 = vmatmul.mubr.msk.f32.gmra.mxu1 %vm258_vm0, %v181_v19  ;;  %1501 = vmatprep.mubr.msk.f32.mxu0 %vm258_vm0, %v182_v20 }
  0xa9   : > { %1597 = vmatprep.mubr.msk.f32.mxu1 %vm258_vm0, %v182_v20 }
  0xab   : > { %1502 = vmatmul.mubr.msk.f32.gmra.mxu0 %vm258_vm0, %v182_v20 }
  0xac   : > { %1598 = vmatmul.mubr.msk.f32.gmra.mxu1 %vm258_vm0, %v182_v20  ;;  %1503 = vmatprep.mubr.msk.f32.mxu0 %vm258_vm0, %v183_v21 }
  0xad   : > { %1599 = vmatprep.mubr.msk.f32.mxu1 %vm258_vm0, %v183_v21 }
  0xaf   : > { %1504 = vmatmul.mubr.msk.f32.gmra.mxu0 %vm258_vm0, %v183_v21 }
  0xb0   : > { %1600 = vmatmul.mubr.msk.f32.gmra.mxu1 %vm258_vm0, %v183_v21  ;;  %1505 = vmatprep.mubr.msk.f32.mxu0 %vm258_vm0, %v184_v22 }
  0xb1   : > { %1601 = vmatprep.mubr.msk.f32.mxu1 %vm258_vm0, %v184_v22 }
  0xb3   : > { %1506 = vmatmul.mubr.msk.f32.gmra.mxu0 %vm258_vm0, %v184_v22 }
  0xb4   : > { %1602 = vmatmul.mubr.msk.f32.gmra.mxu1 %vm258_vm0, %v184_v22  ;;  %1507 = vmatprep.mubr.msk.f32.mxu0 %vm258_vm0, %v185_v23 }
  0xb5   : > { %1603 = vmatprep.mubr.msk.f32.mxu1 %vm258_vm0, %v185_v23 }
  0xb7   : > { %1508 = vmatmul.mubr.msk.f32.gmra.mxu0 %vm258_vm0, %v185_v23 }
  0xb8   : > { %1604 = vmatmul.mubr.msk.f32.gmra.mxu1 %vm258_vm0, %v185_v23  ;;  %1509 = vmatprep.mubr.msk.f32.mxu0 %vm258_vm0, %v186_v24 }
  0xb9   : > { %1605 = vmatprep.mubr.msk.f32.mxu1 %vm258_vm0, %v186_v24 }
  0xbb   : > { %1510 = vmatmul.mubr.msk.f32.gmra.mxu0 %vm258_vm0, %v186_v24 }
  0xbc   : > { %1606 = vmatmul.mubr.msk.f32.gmra.mxu1 %vm258_vm0, %v186_v24  ;;  %1511 = vmatprep.mubr.msk.f32.mxu0 %vm258_vm0, %v187_v25 }
  0xbd   : > { %1607 = vmatprep.mubr.msk.f32.mxu1 %vm258_vm0, %v187_v25 }
  0xbf   : > { %1512 = vmatmul.mubr.msk.f32.gmra.mxu0 %vm258_vm0, %v187_v25 }
  0xc0   : > { %1608 = vmatmul.mubr.msk.f32.gmra.mxu1 %vm258_vm0, %v187_v25  ;;  %1513 = vmatprep.mubr.msk.f32.mxu0 %vm258_vm0, %v188_v26 }
  0xc1   : > { %1609 = vmatprep.mubr.msk.f32.mxu1 %vm258_vm0, %v188_v26 }
  0xc3   : > { %1514 = vmatmul.mubr.msk.f32.gmra.mxu0 %vm258_vm0, %v188_v26 }
  0xc4   : > { %1610 = vmatmul.mubr.msk.f32.gmra.mxu1 %vm258_vm0, %v188_v26  ;;  %1515 = vmatprep.mubr.msk.f32.mxu0 %vm258_vm0, %v189_v27 }
  0xc5   : > { %1611 = vmatprep.mubr.msk.f32.mxu1 %vm258_vm0, %v189_v27 }
  0xc7   : > { %1516 = vmatmul.mubr.msk.f32.gmra.mxu0 %vm258_vm0, %v189_v27 }
  0xc8   : > { %1612 = vmatmul.mubr.msk.f32.gmra.mxu1 %vm258_vm0, %v189_v27  ;;  %1517 = vmatprep.mubr.msk.f32.mxu0 %vm258_vm0, %v190_v28 }
  0xc9   : > { %1613 = vmatprep.mubr.msk.f32.mxu1 %vm258_vm0, %v190_v28 }
  0xcb   : > { %1518 = vmatmul.mubr.msk.f32.gmra.mxu0 %vm258_vm0, %v190_v28 }
  0xcc   : > { %1614 = vmatmul.mubr.msk.f32.gmra.mxu1 %vm258_vm0, %v190_v28  ;;  %1519 = vmatprep.mubr.msk.f32.mxu0 %vm258_vm0, %v191_v29 }
  0xcd   : > { %1615 = vmatprep.mubr.msk.f32.mxu1 %vm258_vm0, %v191_v29 }
  0xcf   : > { %1520 = vmatmul.mubr.msk.f32.gmra.mxu0 %vm258_vm0, %v191_v29 }
  0xd0   : > { %1616 = vmatmul.mubr.msk.f32.gmra.mxu1 %vm258_vm0, %v191_v29  ;;  %1521 = vmatprep.mubr.msk.f32.mxu0 %vm258_vm0, %v192_v30 }
  0xd1   : > { %1617 = vmatprep.mubr.msk.f32.mxu1 %vm258_vm0, %v192_v30 }
  0xd3   : > { %1522 = vmatmul.mubr.msk.f32.gmra.mxu0 %vm258_vm0, %v192_v30 }
  0xd4   : > { %1618 = vmatmul.mubr.msk.f32.gmra.mxu1 %vm258_vm0, %v192_v30  ;;  %1523 = vmatprep.mubr.msk.f32.mxu0 %vm258_vm0, %v193_v31 }
  0xd5   : > { %1619 = vmatprep.mubr.msk.f32.mxu1 %vm258_vm0, %v193_v31 }
  0xd7   : > { %1524 = vmatmul.mubr.msk.f32.gmra.mxu0 %vm258_vm0, %v193_v31 }
  0xd8   : > { %1620 = vmatmul.mubr.msk.f32.gmra.mxu1 %vm258_vm0, %v193_v31 }
 0x11b   : > { %v613_v32 = vpop.f32.mrf.mxu0 }
 0x11c   : > { %v870_v33 = vpop.f32.mrf.mxu1  ;;  %1061 = vst [vmem:[%s2190_s21] sm:$0xff] %v613_v32 }
 0x11d   : > { %1063 = vst [vmem:[%s2190_s21 + $0x10] sm:$0xff] %v870_v33  ;;  %v615_v34 = vpop.f32.mrf.mxu0 }
 0x11e   : > { %v872_v35 = vpop.f32.mrf.mxu1  ;;  %1062 = vst [vmem:[%s2190_s21 + $0x8] sm:$0xff] %v615_v34 }
 0x11f   : > { %1064 = vst [vmem:[%s2190_s21 + $0x18] sm:$0xff] %v872_v35  ;;  %v619_v36 = vpop.f32.mrf.mxu0 }
 0x120   : > { %v876_v37 = vpop.f32.mrf.mxu1  ;;  %1065 = vst [vmem:[%s2190_s21 + $0x20] sm:$0xff] %v619_v36 }
 0x121   : > { %1067 = vst [vmem:[%s2190_s21 + $0x30] sm:$0xff] %v876_v37  ;;  %v621_v38 = vpop.f32.mrf.mxu0 }
 0x122   : > { %v878_v39 = vpop.f32.mrf.mxu1  ;;  %1066 = vst [vmem:[%s2190_s21 + $0x28] sm:$0xff] %v621_v38 }
 0x123   : > { %1068 = vst [vmem:[%s2190_s21 + $0x38] sm:$0xff] %v878_v39  ;;  %v625_v40 = vpop.f32.mrf.mxu0 }
 0x124   : > { %v882_v41 = vpop.f32.mrf.mxu1  ;;  %1069 = vst [vmem:[%s2190_s21 + $0x40] sm:$0xff] %v625_v40 }
 0x125   : > { %1071 = vst [vmem:[%s2190_s21 + $0x50] sm:$0xff] %v882_v41  ;;  %v627_v42 = vpop.f32.mrf.mxu0 }
 0x126   : > { %v884_v43 = vpop.f32.mrf.mxu1  ;;  %1070 = vst [vmem:[%s2190_s21 + $0x48] sm:$0xff] %v627_v42 }
 0x127   : > { %1072 = vst [vmem:[%s2190_s21 + $0x58] sm:$0xff] %v884_v43  ;;  %v631_v44 = vpop.f32.mrf.mxu0 }
 0x128   : > { %v888_v45 = vpop.f32.mrf.mxu1  ;;  %1073 = vst [vmem:[%s2190_s21 + $0x60] sm:$0xff] %v631_v44 }
 0x129   : > { %1075 = vst [vmem:[%s2190_s21 + $0x70] sm:$0xff] %v888_v45  ;;  %v633_v46 = vpop.f32.mrf.mxu0 }
 0x12a   : > { %v890_v47 = vpop.f32.mrf.mxu1  ;;  %1074 = vst [vmem:[%s2190_s21 + $0x68] sm:$0xff] %v633_v46 }
 0x12b   : > { %1076 = vst [vmem:[%s2190_s21 + $0x78] sm:$0xff] %v890_v47  ;;  %v637_v48 = vpop.f32.mrf.mxu0 }
 0x12c   : > { %v894_v49 = vpop.f32.mrf.mxu1  ;;  %1077 = vst [vmem:[%s2190_s21 + $0x80] sm:$0xff] %v637_v48 }
 0x12d   : > { %1079 = vst [vmem:[%s2190_s21 + $0x90] sm:$0xff] %v894_v49  ;;  %v639_v50 = vpop.f32.mrf.mxu0 }
 0x12e   : > { %v896_v51 = vpop.f32.mrf.mxu1  ;;  %1078 = vst [vmem:[%s2190_s21 + $0x88] sm:$0xff] %v639_v50 }
 0x12f   : > { %1080 = vst [vmem:[%s2190_s21 + $0x98] sm:$0xff] %v896_v51  ;;  %v643_v52 = vpop.f32.mrf.mxu0 }
 0x130   : > { %v900_v53 = vpop.f32.mrf.mxu1  ;;  %1081 = vst [vmem:[%s2190_s21 + $0xa0] sm:$0xff] %v643_v52 }
 0x131   : > { %1083 = vst [vmem:[%s2190_s21 + $0xb0] sm:$0xff] %v900_v53  ;;  %v645_v54 = vpop.f32.mrf.mxu0 }
 0x132   : > { %v902_v55 = vpop.f32.mrf.mxu1  ;;  %1082 = vst [vmem:[%s2190_s21 + $0xa8] sm:$0xff] %v645_v54 }
 0x133   : > { %1084 = vst [vmem:[%s2190_s21 + $0xb8] sm:$0xff] %v902_v55  ;;  %v649_v56 = vpop.f32.mrf.mxu0 }
 0x134   : > { %v906_v57 = vpop.f32.mrf.mxu1  ;;  %1085 = vst [vmem:[%s2190_s21 + $0xc0] sm:$0xff] %v649_v56 }
 0x135   : > { %1087 = vst [vmem:[%s2190_s21 + $0xd0] sm:$0xff] %v906_v57  ;;  %v651_v58 = vpop.f32.mrf.mxu0 }
 0x136   : > { %v908_v59 = vpop.f32.mrf.mxu1  ;;  %1086 = vst [vmem:[%s2190_s21 + $0xc8] sm:$0xff] %v651_v58 }
 0x137   : > { %1088 = vst [vmem:[%s2190_s21 + $0xd8] sm:$0xff] %v908_v59  ;;  %v655_v60 = vpop.f32.mrf.mxu0 }
 0x138   : > { %v912_v61 = vpop.f32.mrf.mxu1  ;;  %1089 = vst [vmem:[%s2190_s21 + $0xe0] sm:$0xff] %v655_v60 }
 0x139   : > { %1091 = vst [vmem:[%s2190_s21 + $0xf0] sm:$0xff] %v912_v61  ;;  %v657_v62 = vpop.f32.mrf.mxu0 }
 0x13a   : > { %v914_v63 = vpop.f32.mrf.mxu1  ;;  %1090 = vst [vmem:[%s2190_s21 + $0xe8] sm:$0xff] %v657_v62 }
 0x13b   : > { %1092 = vst [vmem:[%s2190_s21 + $0xf8] sm:$0xff] %v914_v63  ;;  %v661_v1 = vpop.f32.mrf.mxu0 }
 0x13c   : > { %v918_v2 = vpop.f32.mrf.mxu1  ;;  %1093 = vst [vmem:[%s2190_s21 + $0x100] sm:$0xff] %v661_v1 }
 0x13d   : > { %1095 = vst [vmem:[%s2190_s21 + $0x110] sm:$0xff] %v918_v2  ;;  %v663_v3 = vpop.f32.mrf.mxu0 }
 0x13e   : > { %v920_v4 = vpop.f32.mrf.mxu1  ;;  %1094 = vst [vmem:[%s2190_s21 + $0x108] sm:$0xff] %v663_v3 }
 0x13f   : > { %1096 = vst [vmem:[%s2190_s21 + $0x118] sm:$0xff] %v920_v4  ;;  %v667_v0 = vpop.f32.mrf.mxu0 }
 0x140   : > { %v924_v5 = vpop.f32.mrf.mxu1  ;;  %1097 = vst [vmem:[%s2190_s21 + $0x120] sm:$0xff] %v667_v0 }
 0x141   : > { %1099 = vst [vmem:[%s2190_s21 + $0x130] sm:$0xff] %v924_v5  ;;  %v669_v6 = vpop.f32.mrf.mxu0 }
 0x142   : > { %v926_v7 = vpop.f32.mrf.mxu1  ;;  %1098 = vst [vmem:[%s2190_s21 + $0x128] sm:$0xff] %v669_v6 }
 0x143   : > { %1100 = vst [vmem:[%s2190_s21 + $0x138] sm:$0xff] %v926_v7  ;;  %v673_v8 = vpop.f32.mrf.mxu0 }
 0x144   : > { %v930_v9 = vpop.f32.mrf.mxu1  ;;  %1101 = vst [vmem:[%s2190_s21 + $0x140] sm:$0xff] %v673_v8 }
 0x145   : > { %1103 = vst [vmem:[%s2190_s21 + $0x150] sm:$0xff] %v930_v9  ;;  %v675_v10 = vpop.f32.mrf.mxu0 }
 0x146   : > { %v932_v11 = vpop.f32.mrf.mxu1  ;;  %1102 = vst [vmem:[%s2190_s21 + $0x148] sm:$0xff] %v675_v10 }
 0x147   : > { %1104 = vst [vmem:[%s2190_s21 + $0x158] sm:$0xff] %v932_v11  ;;  %v679_v12 = vpop.f32.mrf.mxu0 }
 0x148   : > { %v936_v13 = vpop.f32.mrf.mxu1  ;;  %1105 = vst [vmem:[%s2190_s21 + $0x160] sm:$0xff] %v679_v12 }
 0x149   : > { %1107 = vst [vmem:[%s2190_s21 + $0x170] sm:$0xff] %v936_v13  ;;  %v681_v14 = vpop.f32.mrf.mxu0 }
 0x14a   : > { %v938_v15 = vpop.f32.mrf.mxu1  ;;  %1106 = vst [vmem:[%s2190_s21 + $0x168] sm:$0xff] %v681_v14 }
 0x14b   : > { %1108 = vst [vmem:[%s2190_s21 + $0x178] sm:$0xff] %v938_v15  ;;  %v685_v16 = vpop.f32.mrf.mxu0 }
 0x14c   : > { %v942_v17 = vpop.f32.mrf.mxu1  ;;  %1109 = vst [vmem:[%s2190_s21 + $0x180] sm:$0xff] %v685_v16 }
 0x14d   : > { %1111 = vst [vmem:[%s2190_s21 + $0x190] sm:$0xff] %v942_v17  ;;  %v687_v18 = vpop.f32.mrf.mxu0 }
 0x14e   : > { %v944_v19 = vpop.f32.mrf.mxu1  ;;  %1110 = vst [vmem:[%s2190_s21 + $0x188] sm:$0xff] %v687_v18 }
 0x14f   : > { %1112 = vst [vmem:[%s2190_s21 + $0x198] sm:$0xff] %v944_v19  ;;  %v691_v20 = vpop.f32.mrf.mxu0 }
 0x150   : > { %v948_v21 = vpop.f32.mrf.mxu1  ;;  %1113 = vst [vmem:[%s2190_s21 + $0x1a0] sm:$0xff] %v691_v20 }
 0x151   : > { %1115 = vst [vmem:[%s2190_s21 + $0x1b0] sm:$0xff] %v948_v21  ;;  %v693_v22 = vpop.f32.mrf.mxu0 }
 0x152   : > { %v950_v23 = vpop.f32.mrf.mxu1  ;;  %1114 = vst [vmem:[%s2190_s21 + $0x1a8] sm:$0xff] %v693_v22 }
 0x153   : > { %1116 = vst [vmem:[%s2190_s21 + $0x1b8] sm:$0xff] %v950_v23  ;;  %v697_v24 = vpop.f32.mrf.mxu0 }
 0x154   : > { %v954_v25 = vpop.f32.mrf.mxu1  ;;  %1117 = vst [vmem:[%s2190_s21 + $0x1c0] sm:$0xff] %v697_v24 }
 0x155   : > { %1119 = vst [vmem:[%s2190_s21 + $0x1d0] sm:$0xff] %v954_v25  ;;  %v699_v26 = vpop.f32.mrf.mxu0 }
 0x156   : > { %v956_v27 = vpop.f32.mrf.mxu1  ;;  %1118 = vst [vmem:[%s2190_s21 + $0x1c8] sm:$0xff] %v699_v26 }
 0x157   : > { %1120 = vst [vmem:[%s2190_s21 + $0x1d8] sm:$0xff] %v956_v27  ;;  %v703_v28 = vpop.f32.mrf.mxu0 }
 0x158   : > { %v960_v29 = vpop.f32.mrf.mxu1  ;;  %1121 = vst [vmem:[%s2190_s21 + $0x1e0] sm:$0xff] %v703_v28 }
 0x159   : > { %1123 = vst [vmem:[%s2190_s21 + $0x1f0] sm:$0xff] %v960_v29  ;;  %v705_v30 = vpop.f32.mrf.mxu0 }
 0x15a   : > { %v962_v31 = vpop.f32.mrf.mxu1  ;;  %1122 = vst [vmem:[%s2190_s21 + $0x1e8] sm:$0xff] %v705_v30 }
 0x15b   : > { %1124 = vst [vmem:[%s2190_s21 + $0x1f8] sm:$0xff] %v962_v31  ;;  %v709_v32 = vpop.f32.mrf.mxu0 }
 0x15c   : > { %v966_v33 = vpop.f32.mrf.mxu1  ;;  %1125 = vst [vmem:[%s2190_s21 + $0x200] sm:$0xff] %v709_v32 }
 0x15d   : > { %1127 = vst [vmem:[%s2190_s21 + $0x210] sm:$0xff] %v966_v33  ;;  %v711_v34 = vpop.f32.mrf.mxu0 }
 0x15e   : > { %v968_v35 = vpop.f32.mrf.mxu1  ;;  %1126 = vst [vmem:[%s2190_s21 + $0x208] sm:$0xff] %v711_v34 }
 0x15f   : > { %1128 = vst [vmem:[%s2190_s21 + $0x218] sm:$0xff] %v968_v35  ;;  %v715_v36 = vpop.f32.mrf.mxu0 }
 0x160   : > { %v972_v37 = vpop.f32.mrf.mxu1  ;;  %1129 = vst [vmem:[%s2190_s21 + $0x220] sm:$0xff] %v715_v36 }
 0x161   : > { %1131 = vst [vmem:[%s2190_s21 + $0x230] sm:$0xff] %v972_v37  ;;  %v717_v38 = vpop.f32.mrf.mxu0 }
 0x162   : > { %v974_v39 = vpop.f32.mrf.mxu1  ;;  %1130 = vst [vmem:[%s2190_s21 + $0x228] sm:$0xff] %v717_v38 }
 0x163   : > { %1132 = vst [vmem:[%s2190_s21 + $0x238] sm:$0xff] %v974_v39  ;;  %v721_v40 = vpop.f32.mrf.mxu0 }
 0x164   : > { %v978_v41 = vpop.f32.mrf.mxu1  ;;  %1133 = vst [vmem:[%s2190_s21 + $0x240] sm:$0xff] %v721_v40 }
 0x165   : > { %1135 = vst [vmem:[%s2190_s21 + $0x250] sm:$0xff] %v978_v41  ;;  %v723_v42 = vpop.f32.mrf.mxu0 }
 0x166   : > { %v980_v43 = vpop.f32.mrf.mxu1  ;;  %1134 = vst [vmem:[%s2190_s21 + $0x248] sm:$0xff] %v723_v42 }
 0x167   : > { %1136 = vst [vmem:[%s2190_s21 + $0x258] sm:$0xff] %v980_v43  ;;  %v727_v44 = vpop.f32.mrf.mxu0 }
 0x168   : > { %v984_v45 = vpop.f32.mrf.mxu1  ;;  %1137 = vst [vmem:[%s2190_s21 + $0x260] sm:$0xff] %v727_v44 }
 0x169   : > { %1139 = vst [vmem:[%s2190_s21 + $0x270] sm:$0xff] %v984_v45  ;;  %v729_v46 = vpop.f32.mrf.mxu0 }
 0x16a   : > { %v986_v47 = vpop.f32.mrf.mxu1  ;;  %1138 = vst [vmem:[%s2190_s21 + $0x268] sm:$0xff] %v729_v46 }
 0x16b   : > { %1140 = vst [vmem:[%s2190_s21 + $0x278] sm:$0xff] %v986_v47  ;;  %v733_v48 = vpop.f32.mrf.mxu0 }
 0x16c   : > { %v990_v49 = vpop.f32.mrf.mxu1  ;;  %1141 = vst [vmem:[%s2190_s21 + $0x280] sm:$0xff] %v733_v48 }
 0x16d   : > { %1143 = vst [vmem:[%s2190_s21 + $0x290] sm:$0xff] %v990_v49  ;;  %v735_v50 = vpop.f32.mrf.mxu0 }
 0x16e   : > { %v992_v51 = vpop.f32.mrf.mxu1  ;;  %1142 = vst [vmem:[%s2190_s21 + $0x288] sm:$0xff] %v735_v50 }
 0x16f   : > { %1144 = vst [vmem:[%s2190_s21 + $0x298] sm:$0xff] %v992_v51  ;;  %v739_v52 = vpop.f32.mrf.mxu0 }
 0x170   : > { %v996_v53 = vpop.f32.mrf.mxu1  ;;  %1145 = vst [vmem:[%s2190_s21 + $0x2a0] sm:$0xff] %v739_v52 }
 0x171   : > { %1147 = vst [vmem:[%s2190_s21 + $0x2b0] sm:$0xff] %v996_v53  ;;  %v741_v54 = vpop.f32.mrf.mxu0 }
 0x172   : > { %v998_v55 = vpop.f32.mrf.mxu1  ;;  %1146 = vst [vmem:[%s2190_s21 + $0x2a8] sm:$0xff] %v741_v54 }
 0x173   : > { %1148 = vst [vmem:[%s2190_s21 + $0x2b8] sm:$0xff] %v998_v55  ;;  %v745_v56 = vpop.f32.mrf.mxu0 }
 0x174   : > { %v1002_v57 = vpop.f32.mrf.mxu1  ;;  %1149 = vst [vmem:[%s2190_s21 + $0x2c0] sm:$0xff] %v745_v56 }
 0x175   : > { %1151 = vst [vmem:[%s2190_s21 + $0x2d0] sm:$0xff] %v1002_v57  ;;  %v747_v58 = vpop.f32.mrf.mxu0 }
 0x176   : > { %v1004_v59 = vpop.f32.mrf.mxu1  ;;  %1150 = vst [vmem:[%s2190_s21 + $0x2c8] sm:$0xff] %v747_v58 }
 0x177   : > { %1152 = vst [vmem:[%s2190_s21 + $0x2d8] sm:$0xff] %v1004_v59  ;;  %v751_v60 = vpop.f32.mrf.mxu0 }
 0x178   : > { %v1008_v61 = vpop.f32.mrf.mxu1  ;;  %1153 = vst [vmem:[%s2190_s21 + $0x2e0] sm:$0xff] %v751_v60 }
 0x179   : > { %1155 = vst [vmem:[%s2190_s21 + $0x2f0] sm:$0xff] %v1008_v61  ;;  %v753_v62 = vpop.f32.mrf.mxu0 }
 0x17a   : > { %v1010_v63 = vpop.f32.mrf.mxu1  ;;  %1154 = vst [vmem:[%s2190_s21 + $0x2e8] sm:$0xff] %v753_v62 }
 0x17b   : > { %1156 = vst [vmem:[%s2190_s21 + $0x2f8] sm:$0xff] %v1010_v63  ;;  %v757_v1 = vpop.f32.mrf.mxu0 }
 0x17c   : > { %v1014_v2 = vpop.f32.mrf.mxu1  ;;  %1157 = vst [vmem:[%s2190_s21 + $0x300] sm:$0xff] %v757_v1 }
 0x17d   : > { %1159 = vst [vmem:[%s2190_s21 + $0x310] sm:$0xff] %v1014_v2  ;;  %v759_v3 = vpop.f32.mrf.mxu0 }
 0x17e   : > { %v1016_v4 = vpop.f32.mrf.mxu1  ;;  %1158 = vst [vmem:[%s2190_s21 + $0x308] sm:$0xff] %v759_v3 }
 0x17f   : > { %1160 = vst [vmem:[%s2190_s21 + $0x318] sm:$0xff] %v1016_v4  ;;  %v763_v0 = vpop.f32.mrf.mxu0 }
 0x180   : > { %v1020_v5 = vpop.f32.mrf.mxu1  ;;  %1161 = vst [vmem:[%s2190_s21 + $0x320] sm:$0xff] %v763_v0 }
 0x181   : > { %1163 = vst [vmem:[%s2190_s21 + $0x330] sm:$0xff] %v1020_v5  ;;  %v765_v6 = vpop.f32.mrf.mxu0 }
 0x182   : > { %v1022_v7 = vpop.f32.mrf.mxu1  ;;  %1162 = vst [vmem:[%s2190_s21 + $0x328] sm:$0xff] %v765_v6 }
 0x183   : > { %1164 = vst [vmem:[%s2190_s21 + $0x338] sm:$0xff] %v1022_v7  ;;  %v769_v8 = vpop.f32.mrf.mxu0 }
 0x184   : > { %v1026_v9 = vpop.f32.mrf.mxu1  ;;  %1165 = vst [vmem:[%s2190_s21 + $0x340] sm:$0xff] %v769_v8 }
 0x185   : > { %1167 = vst [vmem:[%s2190_s21 + $0x350] sm:$0xff] %v1026_v9  ;;  %v771_v10 = vpop.f32.mrf.mxu0 }
 0x186   : > { %v1028_v11 = vpop.f32.mrf.mxu1  ;;  %1166 = vst [vmem:[%s2190_s21 + $0x348] sm:$0xff] %v771_v10 }
 0x187   : > { %1168 = vst [vmem:[%s2190_s21 + $0x358] sm:$0xff] %v1028_v11  ;;  %v775_v12 = vpop.f32.mrf.mxu0 }
 0x188   : > { %v1032_v13 = vpop.f32.mrf.mxu1  ;;  %1169 = vst [vmem:[%s2190_s21 + $0x360] sm:$0xff] %v775_v12 }
 0x189   : > { %1171 = vst [vmem:[%s2190_s21 + $0x370] sm:$0xff] %v1032_v13  ;;  %v777_v14 = vpop.f32.mrf.mxu0 }
 0x18a   : > { %v1034_v15 = vpop.f32.mrf.mxu1  ;;  %1170 = vst [vmem:[%s2190_s21 + $0x368] sm:$0xff] %v777_v14 }
 0x18b   : > { %1172 = vst [vmem:[%s2190_s21 + $0x378] sm:$0xff] %v1034_v15  ;;  %v781_v16 = vpop.f32.mrf.mxu0 }
 0x18c   : > { %v1038_v17 = vpop.f32.mrf.mxu1  ;;  %1173 = vst [vmem:[%s2190_s21 + $0x380] sm:$0xff] %v781_v16 }
 0x18d   : > { %1175 = vst [vmem:[%s2190_s21 + $0x390] sm:$0xff] %v1038_v17  ;;  %v783_v18 = vpop.f32.mrf.mxu0 }
 0x18e   : > { %v1040_v19 = vpop.f32.mrf.mxu1  ;;  %1174 = vst [vmem:[%s2190_s21 + $0x388] sm:$0xff] %v783_v18 }
 0x18f   : > { %1176 = vst [vmem:[%s2190_s21 + $0x398] sm:$0xff] %v1040_v19  ;;  %v787_v20 = vpop.f32.mrf.mxu0 }
 0x190   : > { %v1044_v21 = vpop.f32.mrf.mxu1  ;;  %1177 = vst [vmem:[%s2190_s21 + $0x3a0] sm:$0xff] %v787_v20 }
 0x191   : > { %1179 = vst [vmem:[%s2190_s21 + $0x3b0] sm:$0xff] %v1044_v21  ;;  %v789_v22 = vpop.f32.mrf.mxu0 }
 0x192   : > { %v1046_v23 = vpop.f32.mrf.mxu1  ;;  %1178 = vst [vmem:[%s2190_s21 + $0x3a8] sm:$0xff] %v789_v22 }
 0x193   : > { %1180 = vst [vmem:[%s2190_s21 + $0x3b8] sm:$0xff] %v1046_v23  ;;  %v793_v24 = vpop.f32.mrf.mxu0 }
 0x194   : > { %v1050_v25 = vpop.f32.mrf.mxu1  ;;  %1181 = vst [vmem:[%s2190_s21 + $0x3c0] sm:$0xff] %v793_v24 }
 0x195   : > { %1183 = vst [vmem:[%s2190_s21 + $0x3d0] sm:$0xff] %v1050_v25  ;;  %v795_v26 = vpop.f32.mrf.mxu0 }
 0x196   : > { %v1052_v27 = vpop.f32.mrf.mxu1  ;;  %1182 = vst [vmem:[%s2190_s21 + $0x3c8] sm:$0xff] %v795_v26 }
 0x197   : > { %1184 = vst [vmem:[%s2190_s21 + $0x3d8] sm:$0xff] %v1052_v27  ;;  %v799_v28 = vpop.f32.mrf.mxu0 }
 0x198   : > { %v1056_v29 = vpop.f32.mrf.mxu1  ;;  %1185 = vst [vmem:[%s2190_s21 + $0x3e0] sm:$0xff] %v799_v28 }
 0x199   : > { %1187 = vst [vmem:[%s2190_s21 + $0x3f0] sm:$0xff] %v1056_v29  ;;  %v801_v30 = vpop.f32.mrf.mxu0 }
 0x19a   : > { %v1058_v31 = vpop.f32.mrf.mxu1  ;;  %1186 = vst [vmem:[%s2190_s21 + $0x3e8] sm:$0xff] %v801_v30 }
 0x19b   : > { %1188 = vst [vmem:[%s2190_s21 + $0x3f8] sm:$0xff] %v1058_v31 }
 0x19c   : > { %1708 = shalt.err (!%p1705_p6)
}
 0x19d   : > { %s1709_s7 = scalar_lea.hbm %s2321_s29, 16384  ;;  %s1713_s18 = scalar_lea.hbm %s2386_s2, 65536 }
 0x19e   : > { %p1710_p7 = scmp.ne.s32.totalorder %s2321_s29, %s1709_s7  ;;  %p1714_p11 = scmp.lt.s32.totalorder %s2321_s29, %s2386_s2 }
 0x19f   : > { %p1715_p12 = scmp.lt.s32.totalorder %s1713_s18, %s1709_s7 }
 0x1a0   : > { %p1711_p9 = pnand %p1710_p7, %p1859_p3 }
 0x1a1   : > { %p1716_p13 = por %p1715_p12, %p1714_p11 }
 0x1a2   : > { %p1712_p10 = pneg %p1711_p9 }
 0x1a4   : > { %p1717_p0 = pnand %p1716_p13, %p1712_p10 }
 0x1a6   : > { %1720 = shalt.err (!%p1717_p0)
}
 0x1a7   : > { %s1790_s25 = smov 512   ;;  %s1791_s13 = smov 1024  }
 0x1a8   : > { %s1792_s26 = smov 32  }
 0x1a9   : > { %1621 = dma.vmem_to_hbm [thread:$0]  (%p1859_p3), %s2325_s12, 16384, %s2321_s29, %s2333_s30, %s1790_s25, %s1791_s13, %s1792_s26  }
 0x1aa PF: > { %p1627_p1 = scmp.ge.s32.totalorder %s1787_s16, 2  ;;  %s1221_s28 = sand.u32 1, %s1759_s9  }
 0x1ab   : > { %s1222_s3 = scalar_lea.sflag [#allocation3], %s1221_s28 }
 0x1ac   : > { %p1624_p2 = pnand %p1627_p1, %p1868_p8 }
 0x1ae   : > { %p1625_p4 = pneg %p1624_p2 }
 0x1b0   : > { %1754 = dma.done.wait (%p1625_p4), %s1222_s3, 16384  }
 0x1b1   : > { %1756 = vsyncadd (%p1625_p4), %s1222_s3, 4294950912  ;;  %s15_s16 = sadd.s32 1, %s1787_s16   ;;  %s2389_s9 = smov %s1763_s10 }
 0x1b2   : > { %p12_p5 = scmp.ge.s32.totalorder %s15_s16, 6   ;;  %s2390_s10 = smov %s1767_s11 }
 0x1b3   : > { %s2391_s11 = smov %s1877_s27  ;;  %s2392_s12 = smov %s1779_s14 }
 0x1b4   : > { %s2393_s13 = smov %s1783_s15  ;;  %s2394_s14 = smov %s2397_s19 }
 0x1b5   : > { %s2395_s15 = smov %s2401_s20  ;;  %14 = sbr.rel (!%p12_p5) target bundleno = 5 (0x5), region = 64 }
 0x1ba   :  { %1227 = vsyncpa [#allocation3], 1 }
 0x1bb   :  { %1229 = vsyncpa [#allocation3 + $0x1], 1 }

</bundles_post_ra>
